<compile_context>
chip_gen: v5e
topology: v5e:2x2
jax: 0.10.0
libtpu: 0.0.40
codegen_flags: <defaults>
</compile_context>

<pallas_src>
import functools

import jax
import jax.numpy as jnp
from jax.experimental import pallas as pl
from jax.experimental.pallas import tpu as pltpu

_LANE = 128


def _linear_sigmoid_kernel(w_ref, b_ref, x_ref, o_ref):
    # w_ref: SMEM (F,)      b_ref: SMEM (1,)
    # x_ref: VMEM (F, TB)   o_ref: VMEM (1, TB)    (batch on lanes)
    x = x_ref[...]                                     # (F, TB)
    z = x[0:1, :] * w_ref[0]
    for k in range(1, x_ref.shape[0]):                 # F is static (= 4)
        z = z + x[k:k + 1, :] * w_ref[k]               # VPU multiply-adds
    z = z + b_ref[0]
    # exp runs on the EUP; exact f32 divide keeps full accuracy (saturates
    # correctly for large |z|).
    # TODO(synk): on v5e, pl.reciprocal(1.0 + e, approx=True) would move the
    # divide to the EUP slot at ~2^-14 relative error.
    o_ref[...] = (1.0 / (1.0 + jnp.exp(-z))).astype(o_ref.dtype)


@functools.partial(jax.jit, static_argnames=("tile_b",))
def model_forward(x, w, b, *, tile_b=8192):
    """x: [B, F] f32, w: [F, 1] f32 (transposed PyTorch weight), b: [1] f32
    -> sigmoid(x @ w + b): [B, 1] f32."""
    B, F = x.shape
    OUT = w.shape[1]

    # Lane-aligned batch tile: one tile for small B, tile_b-wide tiles otherwise.
    if B < tile_b:
        tb = max(_LANE, ((B + _LANE - 1) // _LANE) * _LANE)
    else:
        tb = tile_b
    b_pad = ((B + tb - 1) // tb) * tb
    num_tiles = b_pad // tb

    # Layout plumbing only: batch-on-lanes + zero padding to the tile boundary.
    x_t = jnp.pad(x.T.astype(jnp.float32), ((0, 0), (0, b_pad - B)))
    w_s = w.reshape(F).astype(jnp.float32)
    b_s = b.reshape(OUT).astype(jnp.float32)

    out = pl.pallas_call(
        _linear_sigmoid_kernel,
        out_shape=jax.ShapeDtypeStruct((OUT, b_pad), jnp.float32),
        grid=(num_tiles,),
        in_specs=[
            pl.BlockSpec(memory_space=pltpu.MemorySpace.SMEM),   # w (4 scalars)
            pl.BlockSpec(memory_space=pltpu.MemorySpace.SMEM),   # b (1 scalar)
            pl.BlockSpec((F, tb), lambda i: (0, i)),             # x tile (F, TB)
        ],
        out_specs=pl.BlockSpec((OUT, tb), lambda i: (0, i)),     # lane-dense out
        compiler_params=pltpu.CompilerParams(
            dimension_semantics=("parallel",),                   # v7x: 2 TCs share grid
        ),
    )(w_s, b_s, x_t)

    return out[:, :B].T                                          # (B, 1)


def _reference(x, w, b):
    return jax.nn.sigmoid(x @ w + b.reshape(1, -1))


if __name__ == "__main__":
    key = jax.random.PRNGKey(0)
    kx, kw, kb = jax.random.split(key, 3)

    B, F, OUT = 2, 4, 1
    # Deterministic parameter init (uniform +-1/sqrt(F), like PyTorch Linear).
    bound = 1.0 / (F ** 0.5)
    x = jax.random.normal(kx, (B, F), dtype=jnp.float32)
    w = jax.random.uniform(kw, (F, OUT), minval=-bound, maxval=bound,
                           dtype=jnp.float32)
    b = jax.random.uniform(kb, (OUT,), minval=-bound, maxval=bound,
                           dtype=jnp.float32)

    out = model_forward(x, w, b)
    jax.block_until_ready(out)
    ref = _reference(x, w, b)
    assert out.shape == (B, OUT)
    assert jnp.allclose(out, ref, atol=1e-5, rtol=1e-5)

    # Also exercise the multi-tile (grid > 1) + padding path.
    xb = jax.random.normal(kx, (1000, F), dtype=jnp.float32)
    out_b = model_forward(xb, w, b, tile_b=256)
    jax.block_until_ready(out_b)
    assert out_b.shape == (1000, OUT)
    assert jnp.allclose(out_b, _reference(xb, w, b), atol=1e-5, rtol=1e-5)

    print("KERNEL_OK")
</pallas_src>

<mosaic_0001>
module attributes {stable_mosaic.version = 11 : i64} {
  func.func @_linear_sigmoid_kernel(%arg0: i32, %arg1: memref<4xf32, #tpu.memory_space<smem>>, %arg2: memref<1xf32, #tpu.memory_space<smem>>, %arg3: memref<4x128xf32, #tpu.memory_space<vmem>>, %arg4: memref<1x128xf32, #tpu.memory_space<vmem>>) attributes {dimension_semantics = [#tpu.dimension_semantics<parallel>], iteration_bounds = array<i64: 1>, scalar_prefetch = 0 : i64, scratch_operands = 0 : i64, tpu.core_type = #tpu.core_type<tc>, window_params = [{transform_indices = @transform_0, window_bounds = array<i64: 4>}, {transform_indices = @transform_1, window_bounds = array<i64: 1>}, {transform_indices = @transform_2, window_bounds = array<i64: 4, 128>}, {transform_indices = @transform_3, window_bounds = array<i64: 1, 128>}]} {
    %c0 = arith.constant 0 : index
    %c0_0 = arith.constant 0 : index
    %0 = vector.load %arg3[%c0, %c0_0] : memref<4x128xf32, #tpu.memory_space<vmem>>, vector<4x128xf32>
    %1 = vector.extract_strided_slice %0 {offsets = [0, 0], sizes = [1, 128], strides = [1, 1]} : vector<4x128xf32> to vector<1x128xf32>
    %c0_1 = arith.constant 0 : index
    %2 = memref.load %arg1[%c0_1] : memref<4xf32, #tpu.memory_space<smem>>
    %3 = vector.broadcast %2 : f32 to vector<1x128xf32>
    %4 = arith.mulf %1, %3 : vector<1x128xf32>
    %5 = vector.extract_strided_slice %0 {offsets = [1, 0], sizes = [1, 128], strides = [1, 1]} : vector<4x128xf32> to vector<1x128xf32>
    %c1 = arith.constant 1 : index
    %6 = memref.load %arg1[%c1] : memref<4xf32, #tpu.memory_space<smem>>
    %7 = vector.broadcast %6 : f32 to vector<1x128xf32>
    %8 = arith.mulf %5, %7 : vector<1x128xf32>
    %9 = arith.addf %4, %8 : vector<1x128xf32>
    %10 = vector.extract_strided_slice %0 {offsets = [2, 0], sizes = [1, 128], strides = [1, 1]} : vector<4x128xf32> to vector<1x128xf32>
    %c2 = arith.constant 2 : index
    %11 = memref.load %arg1[%c2] : memref<4xf32, #tpu.memory_space<smem>>
    %12 = vector.broadcast %11 : f32 to vector<1x128xf32>
    %13 = arith.mulf %10, %12 : vector<1x128xf32>
    %14 = arith.addf %9, %13 : vector<1x128xf32>
    %15 = vector.extract_strided_slice %0 {offsets = [3, 0], sizes = [1, 128], strides = [1, 1]} : vector<4x128xf32> to vector<1x128xf32>
    %c3 = arith.constant 3 : index
    %16 = memref.load %arg1[%c3] : memref<4xf32, #tpu.memory_space<smem>>
    %17 = vector.broadcast %16 : f32 to vector<1x128xf32>
    %18 = arith.mulf %15, %17 : vector<1x128xf32>
    %19 = arith.addf %14, %18 : vector<1x128xf32>
    %c0_2 = arith.constant 0 : index
    %20 = memref.load %arg2[%c0_2] : memref<1xf32, #tpu.memory_space<smem>>
    %21 = vector.broadcast %20 : f32 to vector<1x128xf32>
    %22 = arith.addf %19, %21 : vector<1x128xf32>
    %cst = arith.constant 0.000000e+00 : f32
    %23 = vector.broadcast %cst : f32 to vector<1x128xf32>
    %24 = arith.subf %23, %22 : vector<1x128xf32>
    %25 = math.exp %24 : vector<1x128xf32>
    %cst_3 = arith.constant 1.000000e+00 : f32
    %26 = vector.broadcast %cst_3 : f32 to vector<1x128xf32>
    %27 = arith.addf %26, %25 : vector<1x128xf32>
    %cst_4 = arith.constant 1.000000e+00 : f32
    %28 = vector.broadcast %cst_4 : f32 to vector<1x128xf32>
    %29 = arith.divf %28, %27 : vector<1x128xf32>
    %c0_5 = arith.constant 0 : index
    %c0_6 = arith.constant 0 : index
    %30 = vector.load %arg4[%c0_5, %c0_6] : memref<1x128xf32, #tpu.memory_space<vmem>>, vector<1x128xf32>
    tpu.vector_store %arg4[%c0_5, %c0_6], %29 {strides = array<i32>} : memref<1x128xf32, #tpu.memory_space<vmem>>, vector<1x128xf32>,
    return
  }
  func.func @transform_0(%arg0: i32) -> i32 {
    %c0_i32 = arith.constant 0 : i32
    %c0_i32_0 = arith.constant 0 : i32
    return %c0_i32 : i32
  }
  func.func @transform_1(%arg0: i32) -> i32 {
    %c0_i32 = arith.constant 0 : i32
    %c0_i32_0 = arith.constant 0 : i32
    return %c0_i32 : i32
  }
  func.func @transform_2(%arg0: i32) -> (i32, i32) {
    %c0_i32 = arith.constant 0 : i32
    %c0_i32_0 = arith.constant 0 : i32
    return %c0_i32, %arg0 : i32, i32
  }
  func.func @transform_3(%arg0: i32) -> (i32, i32) {
    %c0_i32 = arith.constant 0 : i32
    %c0_i32_0 = arith.constant 0 : i32
    return %c0_i32, %arg0 : i32, i32
  }
}

</mosaic_0001>

<bundles_post_ra>
// kernel: model_forward.1
= control target key start
LH: loop header
LB: loop body
LE: loop exit
PB: predicated region body
PF: predicated region fallthrough
CT: control target
= control target key end

     0   :  { %9 = vsyncpa [#allocation4], 0  ;;  %s103_s15 = smov [#allocation3]   ;;  %s136_s0 = inlined_call_operand.vmem [shape: f32[4], index: 0, kind: input, shape index: {}]   ;;  %s137_s1 = inlined_call_operand.<no memory space> [shape: f32[1], index: 1, kind: input, shape index: {}]   ;;  %s138_s2 = inlined_call_operand.vmem [shape: f32[4,128], index: 2, kind: input, shape index: {}]   ;;  %s139_s3 = inlined_call_operand.vmem [shape: f32[1,128], index: 3, kind: output, shape index: {}]  }
   0x1   :  { %s15_s14 = sshll.u32 %s136_s0, 4  ;;  %s16_s14 = int_to_ptr.vmem [resolvable:$true] %s15_s14 }
   0x2   :  { %18 = dma.vmem_to_smem %s16_s14, 16, %s103_s15, [#allocation4]  }
   0x3   :  { %101 = dma.done.wait [#allocation4], 16  }
   0x4   :  { %102 = vsyncadd [#allocation4], 4294967280 }
   0x5   :  { %27 = sfence }
   0x6   :  { %s29_s16 = sld [smem:[#allocation3]]  ;;  %v28_v0 = vld [vmem:[%s138_s2] sm:$0xf]  ;;  %v54_v14 = vstv %s137_s1 }
   0x7   :  { %s81_s17 = sld [smem:[#allocation3 + $0x1]] }
   0x8   :  { %s82_s18 = sld [smem:[#allocation3 + $0x2]] }
   0x9   :  { %s83_s19 = sld [smem:[#allocation3 + $0x3]] }
   0xc   :  { %v30_v1 = vstv %s29_s16 }
   0xd   :  { %v33_v2 = vstv %s81_s17  ;;  %v31_v3 = vmul.f32 %v30_v1, %v28_v0 }
   0xe   :  { %v34_v4 = vmul.f32 %v33_v2, %v28_v0  ;;  %v40_v5 = vstv %s82_s18 }
   0xf   :  { %v41_v6 = vmul.f32 %v40_v5, %v28_v0  ;;  %v47_v7 = vstv %s83_s19 }
  0x10   :  { %v36_v8 = vrot.slane %v34_v4, 1  ;;  %v48_v9 = vmul.f32 %v47_v7, %v28_v0 }
  0x11   :  { %v43_v10 = vrot.slane %v41_v6, 2 }
  0x12   :  { %v38_v11 = vadd.f32 %v36_v8, %v31_v3  ;;  %v50_v12 = vrot.slane %v48_v9, 3 }
  0x14   :  { %v45_v13 = vadd.f32 %v43_v10, %v38_v11 }
  0x16   :  { %v52_v15 = vadd.f32 %v50_v12, %v45_v13 }
  0x18   :  { %v55_v16 = vadd.f32 %v54_v14, %v52_v15 }
  0x1a   :  { %v56_v17 = vsub.f32 0.0, %v55_v16 }
  0x1c   :  { %v57_v18 = vmul.f32 1.442695, %v56_v17 }
  0x1e   :  { %85 = vpow2.f32 %v57_v18 }
  0x24   :  { %v86_v19 = vpop.eup %85 }
  0x25   :  { %v59_v20 = vadd.f32 1.0, %v86_v19 }
  0x27   :  { %87 = vrcp.f32 %v59_v20  ;;  %v71_v23 = vand.u32 2147483648, %v59_v20  ;;  %vm65_vm0 = vweird.f32 %v59_v20  ;;  %v69_v25 = vand.u32 2147483647, %v59_v20 }
  0x29   :  { %v72_v27 = vor.u32 1.1754944e-38, %v71_v23  ;;  %vm70_vm3 = vcmp.eq.f32.partialorder %v69_v25, 8.507059e+37 }
  0x2d   :  { %v88_v21 = vpop.eup %87 }
  0x2e   :  { %v61_v22 = vmul.f32 %v88_v21, %v59_v20  ;;  %vm66_vm1 = vweird.f32 %v88_v21 }
  0x2f   :  { %vm67_vm2 = vmor %vm65_vm0, %vm66_vm1 }
  0x30   :  { %v62_v24 = vsub.f32 1.0, %v61_v22 }
  0x32   :  { %v63_v26 = vmul.f32 %v88_v21, %v62_v24 }
  0x34   :  { %v64_v28 = vadd.f32 %v88_v21, %v63_v26 }
  0x36   :  { %v68_v29 = vsel %vm67_vm2, %v88_v21, %v64_v28 }
  0x37   :  { %v73_v30 = vsel %vm70_vm3, %v72_v27, %v68_v29 }
  0x38   :  { %75 = vst [vmem:[%s139_s3] sm:$0x1] %v73_v30 }
  0x39   :  { %80 = vsyncpa [#allocation4], 1 }

</bundles_post_ra>
